<compile_context>
chip_gen: v7x
topology: tpu7x:2x2x1
jax: 0.10.0
libtpu: 0.0.40
codegen_flags: <defaults>
</compile_context>

<pallas_src>
import functools

import jax
import jax.numpy as jnp
from jax.experimental import pallas as pl
from jax.experimental.pallas import tpu as pltpu

BN_EPS = 1e-5
_HI = jax.lax.Precision.HIGHEST


def _pick_tile(p):
    """Largest lane-friendly pixel tile that divides P (fallback: full P)."""
    for t in (2048, 1024, 512, 256, 128):
        if p % t == 0:
            return t
    return p


def _stats_fold_kernel(x_ref, wbT_ref, bb_ref, gamma_ref, beta_ref,
                       whT_ref, bh_ref, weff_ref, beff_ref,
                       sx_acc, g_acc, *, n_total):
    b = pl.program_id(0)
    t = pl.program_id(1)
    is_first = jnp.logical_and(b == 0, t == 0)
    is_last = jnp.logical_and(b == pl.num_programs(0) - 1,
                              t == pl.num_programs(1) - 1)

    @pl.when(is_first)
    def _():
        sx_acc[...] = jnp.zeros_like(sx_acc)
        g_acc[...] = jnp.zeros_like(g_acc)

    x = x_ref[0]                                               # [Cin, TILE_P]
    sx_acc[...] += jnp.sum(x, axis=-1, keepdims=True)          # [Cin, 1]
    g_acc[...] += jax.lax.dot_general(                         # [Cin, Cin]
        x, x, dimension_numbers=(((1,), (1,)), ((), ())),
        preferred_element_type=jnp.float32, precision=_HI)

    @pl.when(is_last)
    def _():
        n = jnp.float32(n_total)
        sx = sx_acc[...]            # [Cin, 1]
        g = g_acc[...]              # [Cin, Cin]
        wbT = wbT_ref[...]          # [F, Cin]
        bb = bb_ref[...]            # [F, 1]
        gamma = gamma_ref[...]      # [F, 1]
        beta = beta_ref[...]        # [F, 1]
        whT = whT_ref[...]          # [3nc, F]
        bh = bh_ref[...]            # [3nc, 1]

        # BatchNorm batch statistics of feat = Wb^T x + bb, from Sx / Gram.
        w_sx = jnp.dot(wbT, sx, preferred_element_type=jnp.float32,
                       precision=_HI)                                   # [F,1]
        mu = (w_sx + n * bb) / n
        quad = jnp.sum(jnp.dot(wbT, g, preferred_element_type=jnp.float32,
                               precision=_HI) * wbT,
                       axis=1, keepdims=True)                            # [F,1]
        sumsq = quad + 2.0 * bb * w_sx + n * bb * bb
        var = jnp.maximum(sumsq / n - mu * mu, 0.0)
        s = jax.lax.rsqrt(var + BN_EPS) * gamma                          # [F,1]

        # Fold backbone conv + BN affine + heads into one weight / bias.
        weff_ref[...] = jnp.dot(whT, s * wbT,
                                preferred_element_type=jnp.float32,
                                precision=_HI)                      # [3nc,Cin]
        beff_ref[...] = jnp.dot(whT, s * (bb - mu) + beta,
                                preferred_element_type=jnp.float32,
                                precision=_HI) + bh                   # [3nc,1]


def _heads_kernel(x_ref, weff_ref, beff_ref, out_ref):
    x = x_ref[0]                                               # [Cin, TILE_P]
    y = jnp.dot(weff_ref[...], x, preferred_element_type=jnp.float32,
                precision=_HI) + beff_ref[...]
    out_ref[0] = y.astype(out_ref.dtype)                       # [3nc, TILE_P]


def multihead_forward(x_nchw, params):
    """x_nchw: [B, Cin, H, W] float32. Returns dict of NCHW logits."""
    B, Cin, H, W = x_nchw.shape
    F = params["wb"].shape[1]
    nc = params["wm"].shape[1]
    C3 = 3 * nc
    P = H * W
    n_total = B * P

    x = x_nchw.reshape(B, Cin, P)          # free reshape, stays channels-first
    tile_p = _pick_tile(P)
    n_tiles = P // tile_p

    # Tiny one-off parameter repacks (XLA-level, negligible).
    wbT = params["wb"].T                                           # [F, Cin]
    bb = params["bb"].reshape(F, 1)
    gamma = params["gamma"].reshape(F, 1)
    beta = params["beta"].reshape(F, 1)
    whT = jnp.concatenate(
        [params["wm"].T, params["wl"].T, params["wu"].T], axis=0)  # [3nc, F]
    bh = jnp.concatenate(
        [params["bm"].reshape(nc, 1), params["bl"].reshape(nc, 1),
         params["bu"].reshape(nc, 1)], axis=0)                     # [3nc, 1]

    x_spec = pl.BlockSpec((1, Cin, tile_p), lambda b, t: (b, 0, t))

    def full(shape):
        return pl.BlockSpec(shape, lambda b, t: (0, 0))

    # Pass 1: BN statistics via x-sums / Gram matrix, then weight fold.
    weff, beff = pl.pallas_call(
        functools.partial(_stats_fold_kernel, n_total=float(n_total)),
        out_shape=(jax.ShapeDtypeStruct((C3, Cin), jnp.float32),
                   jax.ShapeDtypeStruct((C3, 1), jnp.float32)),
        grid_spec=pltpu.PrefetchScalarGridSpec(
            num_scalar_prefetch=0,
            grid=(B, n_tiles),
            in_specs=[x_spec, full((F, Cin)), full((F, 1)), full((F, 1)),
                      full((F, 1)), full((C3, F)), full((C3, 1))],
            out_specs=[full((C3, Cin)), full((C3, 1))],
            scratch_shapes=[pltpu.VMEM((Cin, 1), jnp.float32),
                            pltpu.VMEM((Cin, Cin), jnp.float32)]),
        compiler_params=pltpu.CompilerParams(
            dimension_semantics=("arbitrary", "arbitrary")),
    )(x, wbT, bb, gamma, beta, whT, bh)

    # Pass 2: fused-head matmul, lane-dense [B, 3nc, P] output slab.
    out = pl.pallas_call(
        _heads_kernel,
        out_shape=jax.ShapeDtypeStruct((B, C3, P), jnp.float32),
        grid_spec=pltpu.PrefetchScalarGridSpec(
            num_scalar_prefetch=0,
            grid=(B, n_tiles),
            in_specs=[x_spec, full((C3, Cin)), full((C3, 1))],
            out_specs=pl.BlockSpec((1, C3, tile_p), lambda b, t: (b, 0, t))),
        compiler_params=pltpu.CompilerParams(
            dimension_semantics=("parallel", "parallel")),
    )(x, weff, beff)

    out = out.reshape(B, C3, H, W)
    return {"logits": out[:, 0:nc],
            "lower": out[:, nc:2 * nc],
            "upper": out[:, 2 * nc:3 * nc]}


def make_params(key, in_channels, output_features, n_classes):
    ks = jax.random.split(key, 8)
    f = output_features
    return {
        "wb": jax.random.normal(ks[0], (in_channels, f), jnp.float32) * 0.2,
        "bb": jax.random.normal(ks[1], (1, f), jnp.float32) * 0.05,
        "gamma": jnp.ones((1, f), jnp.float32),
        "beta": jnp.zeros((1, f), jnp.float32),
        "wm": jax.random.normal(ks[2], (f, n_classes), jnp.float32) * 0.1,
        "bm": jax.random.normal(ks[3], (1, n_classes), jnp.float32) * 0.05,
        "wl": jax.random.normal(ks[4], (f, n_classes), jnp.float32) * 0.1,
        "bl": jax.random.normal(ks[5], (1, n_classes), jnp.float32) * 0.05,
        "wu": jax.random.normal(ks[6], (f, n_classes), jnp.float32) * 0.1,
        "bu": jax.random.normal(ks[7], (1, n_classes), jnp.float32) * 0.05,
    }


def _reference_forward(x_nchw, params):
    """Pure-JAX reference of the same math (two-pass BN, unfused heads)."""
    B, Cin, H, W = x_nchw.shape
    xf = jnp.transpose(x_nchw, (0, 2, 3, 1)).reshape(B * H * W, Cin)
    feat = jnp.dot(xf, params["wb"], precision=_HI) + params["bb"]
    mu = feat.mean(axis=0, keepdims=True)
    var = ((feat - mu) ** 2).mean(axis=0, keepdims=True)
    normed = ((feat - mu) * jax.lax.rsqrt(var + BN_EPS) * params["gamma"]
              + params["beta"])
    outs = {}
    for name, w, b in (("logits", "wm", "bm"), ("lower", "wl", "bl"),
                       ("upper", "wu", "bu")):
        y = jnp.dot(normed, params[w], precision=_HI) + params[b]
        ncl = y.shape[-1]
        outs[name] = jnp.transpose(y.reshape(B, H, W, ncl), (0, 3, 1, 2))
    return outs


if __name__ == "__main__":
    B, Cin, H, W = 2, 4, 16, 16
    output_features, n_classes = 32, 4

    key = jax.random.PRNGKey(0)
    kx, kp = jax.random.split(key)
    x = jax.random.normal(kx, (B, Cin, H, W), jnp.float32)
    params = make_params(kp, Cin, output_features, n_classes)

    fwd = jax.jit(multihead_forward)
    out = fwd(x, params)
    jax.block_until_ready(out)

    ref = _reference_forward(x, params)
    for name in ("logits", "upper", "lower"):
        assert out[name].shape == (B, n_classes, H, W)
        err = float(jnp.max(jnp.abs(out[name] - ref[name])))
        assert err < 5e-4, f"{name} mismatch: {err}"

    print("KERNEL_OK")
</pallas_src>

<mosaic_0001>
module attributes {stable_mosaic.version = 11 : i64} {
  func.func @_heads_kernel(%arg0: i32, %arg1: i32, %arg2: memref<1x4x256xf32, #tpu.memory_space<vmem>>, %arg3: memref<12x4xf32, #tpu.memory_space<vmem>>, %arg4: memref<12x1xf32, #tpu.memory_space<vmem>>, %arg5: memref<1x12x256xf32, #tpu.memory_space<vmem>>) attributes {dimension_semantics = [#tpu.dimension_semantics<parallel>, #tpu.dimension_semantics<parallel>], iteration_bounds = array<i64: 2, 1>, scalar_prefetch = 0 : i64, scratch_operands = 0 : i64, tpu.core_type = #tpu.core_type<tc>, window_params = [{transform_indices = @transform_0, window_bounds = array<i64: 1, 4, 256>}, {pipeline_mode = #tpu.pipeline_mode<synchronous>, transform_indices = @transform_1, window_bounds = array<i64: 12, 4>}, {pipeline_mode = #tpu.pipeline_mode<synchronous>, transform_indices = @transform_2, window_bounds = array<i64: 12, 1>}, {transform_indices = @transform_3, window_bounds = array<i64: 1, 12, 256>}]} {
    %c0 = arith.constant 0 : index
    %c0_0 = arith.constant 0 : index
    %c0_1 = arith.constant 0 : index
    %0 = vector.load %arg2[%c0, %c0_0, %c0_1] : memref<1x4x256xf32, #tpu.memory_space<vmem>>, vector<1x4x256xf32>
    %1 = vector.shape_cast %0 : vector<1x4x256xf32> to vector<4x256xf32>
    %c0_2 = arith.constant 0 : index
    %c0_3 = arith.constant 0 : index
    %2 = vector.load %arg3[%c0_2, %c0_3] : memref<12x4xf32, #tpu.memory_space<vmem>>, vector<12x4xf32>
    %cst = arith.constant dense<0.000000e+00> : vector<12x256xf32>
    %3 = tpu.matmul %2, %1, %cst {dimension_numbers = #tpu.dot_dimension_numbers<[1], [0], [0], [1], [0, 0, 1, 1], [], []>, precision = #tpu.contract_precision<fp32>} : vector<12x4xf32>, vector<4x256xf32>, vector<12x256xf32> -> vector<12x256xf32>
    %c0_4 = arith.constant 0 : index
    %c0_5 = arith.constant 0 : index
    %4 = vector.load %arg4[%c0_4, %c0_5] : memref<12x1xf32, #tpu.memory_space<vmem>>, vector<12x1xf32>
    %5 = vector.broadcast %4 : vector<12x1xf32> to vector<12x256xf32>
    %6 = arith.addf %3, %5 : vector<12x256xf32>
    %c0_6 = arith.constant 0 : index
    %c0_7 = arith.constant 0 : index
    %c0_8 = arith.constant 0 : index
    %7 = vector.load %arg5[%c0_6, %c0_7, %c0_8] : memref<1x12x256xf32, #tpu.memory_space<vmem>>, vector<1x12x256xf32>
    %8 = vector.shape_cast %7 : vector<1x12x256xf32> to vector<12x256xf32>
    %9 = vector.shape_cast %6 : vector<12x256xf32> to vector<1x12x256xf32>
    tpu.vector_store %arg5[%c0_6, %c0_7, %c0_8], %9 {strides = array<i32>} : memref<1x12x256xf32, #tpu.memory_space<vmem>>, vector<1x12x256xf32>,
    return
  }
  func.func @transform_0(%arg0: i32, %arg1: i32) -> (i32, i32, i32) {
    %c0_i32 = arith.constant 0 : i32
    %c0_i32_0 = arith.constant 0 : i32
    return %arg0, %c0_i32, %arg1 : i32, i32, i32
  }
  func.func @transform_1(%arg0: i32, %arg1: i32) -> (i32, i32) {
    %c0_i32 = arith.constant 0 : i32
    %c0_i32_0 = arith.constant 0 : i32
    %c0_i32_1 = arith.constant 0 : i32
    return %c0_i32, %c0_i32_0 : i32, i32
  }
  func.func @transform_2(%arg0: i32, %arg1: i32) -> (i32, i32) {
    %c0_i32 = arith.constant 0 : i32
    %c0_i32_0 = arith.constant 0 : i32
    %c0_i32_1 = arith.constant 0 : i32
    return %c0_i32, %c0_i32_0 : i32, i32
  }
  func.func @transform_3(%arg0: i32, %arg1: i32) -> (i32, i32, i32) {
    %c0_i32 = arith.constant 0 : i32
    %c0_i32_0 = arith.constant 0 : i32
    return %arg0, %c0_i32, %arg1 : i32, i32, i32
  }
}

module attributes {stable_mosaic.version = 11 : i64} {
  func.func @_stats_fold_kernel(%arg0: i32, %arg1: i32, %arg2: memref<1x4x256xf32, #tpu.memory_space<vmem>>, %arg3: memref<32x4xf32, #tpu.memory_space<vmem>>, %arg4: memref<32x1xf32, #tpu.memory_space<vmem>>, %arg5: memref<32x1xf32, #tpu.memory_space<vmem>>, %arg6: memref<32x1xf32, #tpu.memory_space<vmem>>, %arg7: memref<12x32xf32, #tpu.memory_space<vmem>>, %arg8: memref<12x1xf32, #tpu.memory_space<vmem>>, %arg9: memref<12x4xf32, #tpu.memory_space<vmem>>, %arg10: memref<12x1xf32, #tpu.memory_space<vmem>>, %arg11: memref<4x1xf32, #tpu.memory_space<vmem>>, %arg12: memref<4x4xf32, #tpu.memory_space<vmem>>) attributes {dimension_semantics = [#tpu.dimension_semantics<arbitrary>, #tpu.dimension_semantics<arbitrary>], iteration_bounds = array<i64: 2, 1>, scalar_prefetch = 0 : i64, scratch_operands = 2 : i64, tpu.core_type = #tpu.core_type<tc>, window_params = [{transform_indices = @transform_0, window_bounds = array<i64: 1, 4, 256>}, {pipeline_mode = #tpu.pipeline_mode<synchronous>, transform_indices = @transform_1, window_bounds = array<i64: 32, 4>}, {pipeline_mode = #tpu.pipeline_mode<synchronous>, transform_indices = @transform_2, window_bounds = array<i64: 32, 1>}, {pipeline_mode = #tpu.pipeline_mode<synchronous>, transform_indices = @transform_3, window_bounds = array<i64: 32, 1>}, {pipeline_mode = #tpu.pipeline_mode<synchronous>, transform_indices = @transform_4, window_bounds = array<i64: 32, 1>}, {pipeline_mode = #tpu.pipeline_mode<synchronous>, transform_indices = @transform_5, window_bounds = array<i64: 12, 32>}, {pipeline_mode = #tpu.pipeline_mode<synchronous>, transform_indices = @transform_6, window_bounds = array<i64: 12, 1>}, {pipeline_mode = #tpu.pipeline_mode<synchronous>, transform_indices = @transform_7, window_bounds = array<i64: 12, 4>}, {pipeline_mode = #tpu.pipeline_mode<synchronous>, transform_indices = @transform_8, window_bounds = array<i64: 12, 1>}]} {
    %c0_i32 = arith.constant 0 : i32
    %0 = arith.cmpi eq, %arg0, %c0_i32 : i32
    %c0_i32_0 = arith.constant 0 : i32
    %1 = arith.cmpi eq, %arg1, %c0_i32_0 : i32
    %2 = arith.andi %0, %1 : i1
    %c1_i32 = arith.constant 1 : i32
    %3 = arith.cmpi eq, %arg0, %c1_i32 : i32
    %c0_i32_1 = arith.constant 0 : i32
    %4 = arith.cmpi eq, %arg1, %c0_i32_1 : i32
    %5 = arith.andi %3, %4 : i1
    %6 = arith.extui %2 : i1 to i32
    %c0_i32_2 = arith.constant 0 : i32
    %7 = arith.cmpi ne, %6, %c0_i32_2 : i32
    scf.if %7 {
      %cst_15 = arith.constant 0.000000e+00 : f32
      %21 = vector.broadcast %cst_15 : f32 to vector<4x1xf32>
      %c0_16 = arith.constant 0 : index
      %c0_17 = arith.constant 0 : index
      %22 = vector.load %arg11[%c0_16, %c0_17] : memref<4x1xf32, #tpu.memory_space<vmem>>, vector<4x1xf32>
      tpu.vector_store %arg11[%c0_16, %c0_17], %21 {strides = array<i32>} : memref<4x1xf32, #tpu.memory_space<vmem>>, vector<4x1xf32>,
      %cst_18 = arith.constant 0.000000e+00 : f32
      %23 = vector.broadcast %cst_18 : f32 to vector<4x4xf32>
      %c0_19 = arith.constant 0 : index
      %c0_20 = arith.constant 0 : index
      %24 = vector.load %arg12[%c0_19, %c0_20] : memref<4x4xf32, #tpu.memory_space<vmem>>, vector<4x4xf32>
      tpu.vector_store %arg12[%c0_19, %c0_20], %23 {strides = array<i32>} : memref<4x4xf32, #tpu.memory_space<vmem>>, vector<4x4xf32>,
    } else {
    }
    %c0 = arith.constant 0 : index
    %c0_3 = arith.constant 0 : index
    %c0_4 = arith.constant 0 : index
    %8 = vector.load %arg2[%c0, %c0_3, %c0_4] : memref<1x4x256xf32, #tpu.memory_space<vmem>>, vector<1x4x256xf32>
    %9 = vector.shape_cast %8 : vector<1x4x256xf32> to vector<4x256xf32>
    %c0_5 = arith.constant 0 : index
    %c0_6 = arith.constant 0 : index
    %10 = vector.load %arg11[%c0_5, %c0_6] : memref<4x1xf32, #tpu.memory_space<vmem>>, vector<4x1xf32>
    %cst = arith.constant dense<0.000000e+00> : vector<4xf32>
    %11 = vector.multi_reduction <add>, %9, %cst [1] : vector<4x256xf32> to vector<4xf32>
    %12 = vector.shape_cast %11 : vector<4xf32> to vector<4x1xf32>
    %13 = arith.addf %10, %12 : vector<4x1xf32>
    %c0_7 = arith.constant 0 : index
    %c0_8 = arith.constant 0 : index
    %14 = vector.load %arg11[%c0_7, %c0_8] : memref<4x1xf32, #tpu.memory_space<vmem>>, vector<4x1xf32>
    tpu.vector_store %arg11[%c0_7, %c0_8], %13 {strides = array<i32>} : memref<4x1xf32, #tpu.memory_space<vmem>>, vector<4x1xf32>,
    %c0_9 = arith.constant 0 : index
    %c0_10 = arith.constant 0 : index
    %15 = vector.load %arg12[%c0_9, %c0_10] : memref<4x4xf32, #tpu.memory_space<vmem>>, vector<4x4xf32>
    %cst_11 = arith.constant dense<0.000000e+00> : vector<4x4xf32>
    %16 = tpu.matmul %9, %9, %cst_11 {dimension_numbers = #tpu.dot_dimension_numbers<[1], [1], [0], [0], [0, 0, 1, 0], [], []>, precision = #tpu.contract_precision<fp32>} : vector<4x256xf32>, vector<4x256xf32>, vector<4x4xf32> -> vector<4x4xf32>
    %17 = arith.addf %15, %16 : vector<4x4xf32>
    %c0_12 = arith.constant 0 : index
    %c0_13 = arith.constant 0 : index
    %18 = vector.load %arg12[%c0_12, %c0_13] : memref<4x4xf32, #tpu.memory_space<vmem>>, vector<4x4xf32>
    tpu.vector_store %arg12[%c0_12, %c0_13], %17 {strides = array<i32>} : memref<4x4xf32, #tpu.memory_space<vmem>>, vector<4x4xf32>,
    %19 = arith.extui %5 : i1 to i32
    %c0_i32_14 = arith.constant 0 : i32
    %20 = arith.cmpi ne, %19, %c0_i32_14 : i32
    scf.if %20 {
      %c0_15 = arith.constant 0 : index
      %c0_16 = arith.constant 0 : index
      %21 = vector.load %arg11[%c0_15, %c0_16] : memref<4x1xf32, #tpu.memory_space<vmem>>, vector<4x1xf32>
      %c0_17 = arith.constant 0 : index
      %c0_18 = arith.constant 0 : index
      %22 = vector.load %arg12[%c0_17, %c0_18] : memref<4x4xf32, #tpu.memory_space<vmem>>, vector<4x4xf32>
      %c0_19 = arith.constant 0 : index
      %c0_20 = arith.constant 0 : index
      %23 = vector.load %arg3[%c0_19, %c0_20] : memref<32x4xf32, #tpu.memory_space<vmem>>, vector<32x4xf32>
      %c0_21 = arith.constant 0 : index
      %c0_22 = arith.constant 0 : index
      %24 = vector.load %arg4[%c0_21, %c0_22] : memref<32x1xf32, #tpu.memory_space<vmem>>, vector<32x1xf32>
      %c0_23 = arith.constant 0 : index
      %c0_24 = arith.constant 0 : index
      %25 = vector.load %arg5[%c0_23, %c0_24] : memref<32x1xf32, #tpu.memory_space<vmem>>, vector<32x1xf32>
      %c0_25 = arith.constant 0 : index
      %c0_26 = arith.constant 0 : index
      %26 = vector.load %arg6[%c0_25, %c0_26] : memref<32x1xf32, #tpu.memory_space<vmem>>, vector<32x1xf32>
      %c0_27 = arith.constant 0 : index
      %c0_28 = arith.constant 0 : index
      %27 = vector.load %arg7[%c0_27, %c0_28] : memref<12x32xf32, #tpu.memory_space<vmem>>, vector<12x32xf32>
      %c0_29 = arith.constant 0 : index
      %c0_30 = arith.constant 0 : index
      %28 = vector.load %arg8[%c0_29, %c0_30] : memref<12x1xf32, #tpu.memory_space<vmem>>, vector<12x1xf32>
      %cst_31 = arith.constant dense<0.000000e+00> : vector<32x1xf32>
      %29 = tpu.matmul %23, %21, %cst_31 {dimension_numbers = #tpu.dot_dimension_numbers<[1], [0], [0], [1], [0, 0, 1, 1], [], []>, precision = #tpu.contract_precision<fp32>} : vector<32x4xf32>, vector<4x1xf32>, vector<32x1xf32> -> vector<32x1xf32>
      %cst_32 = arith.constant 5.120000e+02 : f32
      %30 = vector.broadcast %cst_32 : f32 to vector<32x1xf32>
      %31 = arith.mulf %30, %24 : vector<32x1xf32>
      %32 = arith.addf %29, %31 : vector<32x1xf32>
      %cst_33 = arith.constant 5.120000e+02 : f32
      %33 = vector.broadcast %cst_33 : f32 to vector<32x1xf32>
      %34 = arith.divf %32, %33 : vector<32x1xf32>
      %cst_34 = arith.constant dense<0.000000e+00> : vector<32x4xf32>
      %35 = tpu.matmul %23, %22, %cst_34 {dimension_numbers = #tpu.dot_dimension_numbers<[1], [0], [0], [1], [0, 0, 1, 1], [], []>, precision = #tpu.contract_precision<fp32>} : vector<32x4xf32>, vector<4x4xf32>, vector<32x4xf32> -> vector<32x4xf32>
      %36 = arith.mulf %35, %23 : vector<32x4xf32>
      %cst_35 = arith.constant dense<0.000000e+00> : vector<32xf32>
      %37 = vector.multi_reduction <add>, %36, %cst_35 [1] : vector<32x4xf32> to vector<32xf32>
      %38 = vector.shape_cast %37 : vector<32xf32> to vector<32x1xf32>
      %cst_36 = arith.constant 2.000000e+00 : f32
      %39 = vector.broadcast %cst_36 : f32 to vector<32x1xf32>
      %40 = arith.mulf %39, %24 : vector<32x1xf32>
      %41 = arith.mulf %40, %29 : vector<32x1xf32>
      %42 = arith.addf %38, %41 : vector<32x1xf32>
      %cst_37 = arith.constant 5.120000e+02 : f32
      %43 = vector.broadcast %cst_37 : f32 to vector<32x1xf32>
      %44 = arith.mulf %43, %24 : vector<32x1xf32>
      %45 = arith.mulf %44, %24 : vector<32x1xf32>
      %46 = arith.addf %42, %45 : vector<32x1xf32>
      %cst_38 = arith.constant 5.120000e+02 : f32
      %47 = vector.broadcast %cst_38 : f32 to vector<32x1xf32>
      %48 = arith.divf %46, %47 : vector<32x1xf32>
      %49 = arith.mulf %34, %34 : vector<32x1xf32>
      %50 = arith.subf %48, %49 : vector<32x1xf32>
      %cst_39 = arith.constant 0.000000e+00 : f32
      %51 = vector.broadcast %cst_39 : f32 to vector<32x1xf32>
      %52 = arith.maximumf %50, %51 : vector<32x1xf32>
      %cst_40 = arith.constant 9.99999974E-6 : f32
      %53 = vector.broadcast %cst_40 : f32 to vector<32x1xf32>
      %54 = arith.addf %52, %53 : vector<32x1xf32>
      %55 = math.rsqrt %54 : vector<32x1xf32>
      %56 = arith.mulf %55, %25 : vector<32x1xf32>
      %57 = vector.broadcast %56 : vector<32x1xf32> to vector<32x4xf32>
      %58 = arith.mulf %57, %23 : vector<32x4xf32>
      %cst_41 = arith.constant dense<0.000000e+00> : vector<12x4xf32>
      %59 = tpu.matmul %27, %58, %cst_41 {dimension_numbers = #tpu.dot_dimension_numbers<[1], [0], [0], [1], [0, 0, 1, 1], [], []>, precision = #tpu.contract_precision<fp32>} : vector<12x32xf32>, vector<32x4xf32>, vector<12x4xf32> -> vector<12x4xf32>
      %c0_42 = arith.constant 0 : index
      %c0_43 = arith.constant 0 : index
      %60 = vector.load %arg9[%c0_42, %c0_43] : memref<12x4xf32, #tpu.memory_space<vmem>>, vector<12x4xf32>
      tpu.vector_store %arg9[%c0_42, %c0_43], %59 {strides = array<i32>} : memref<12x4xf32, #tpu.memory_space<vmem>>, vector<12x4xf32>,
      %61 = arith.subf %24, %34 : vector<32x1xf32>
      %62 = arith.mulf %56, %61 : vector<32x1xf32>
      %63 = arith.addf %62, %26 : vector<32x1xf32>
      %cst_44 = arith.constant dense<0.000000e+00> : vector<12x1xf32>
      %64 = tpu.matmul %27, %63, %cst_44 {dimension_numbers = #tpu.dot_dimension_numbers<[1], [0], [0], [1], [0, 0, 1, 1], [], []>, precision = #tpu.contract_precision<fp32>} : vector<12x32xf32>, vector<32x1xf32>, vector<12x1xf32> -> vector<12x1xf32>
      %65 = arith.addf %64, %28 : vector<12x1xf32>
      %c0_45 = arith.constant 0 : index
      %c0_46 = arith.constant 0 : index
      %66 = vector.load %arg10[%c0_45, %c0_46] : memref<12x1xf32, #tpu.memory_space<vmem>>, vector<12x1xf32>
      tpu.vector_store %arg10[%c0_45, %c0_46], %65 {strides = array<i32>} : memref<12x1xf32, #tpu.memory_space<vmem>>, vector<12x1xf32>,
    } else {
    }
    return
  }
  func.func @transform_0(%arg0: i32, %arg1: i32) -> (i32, i32, i32) {
    %c0_i32 = arith.constant 0 : i32
    %c0_i32_0 = arith.constant 0 : i32
    return %arg0, %c0_i32, %arg1 : i32, i32, i32
  }
  func.func @transform_1(%arg0: i32, %arg1: i32) -> (i32, i32) {
    %c0_i32 = arith.constant 0 : i32
    %c0_i32_0 = arith.constant 0 : i32
    %c0_i32_1 = arith.constant 0 : i32
    return %c0_i32, %c0_i32_0 : i32, i32
  }
  func.func @transform_2(%arg0: i32, %arg1: i32) -> (i32, i32) {
    %c0_i32 = arith.constant 0 : i32
    %c0_i32_0 = arith.constant 0 : i32
    %c0_i32_1 = arith.constant 0 : i32
    return %c0_i32, %c0_i32_0 : i32, i32
  }
  func.func @transform_3(%arg0: i32, %arg1: i32) -> (i32, i32) {
    %c0_i32 = arith.constant 0 : i32
    %c0_i32_0 = arith.constant 0 : i32
    %c0_i32_1 = arith.constant 0 : i32
    return %c0_i32, %c0_i32_0 : i32, i32
  }
  func.func @transform_4(%arg0: i32, %arg1: i32) -> (i32, i32) {
    %c0_i32 = arith.constant 0 : i32
    %c0_i32_0 = arith.constant 0 : i32
    %c0_i32_1 = arith.constant 0 : i32
    return %c0_i32, %c0_i32_0 : i32, i32
  }
  func.func @transform_5(%arg0: i32, %arg1: i32) -> (i32, i32) {
    %c0_i32 = arith.constant 0 : i32
    %c0_i32_0 = arith.constant 0 : i32
    %c0_i32_1 = arith.constant 0 : i32
    return %c0_i32, %c0_i32_0 : i32, i32
  }
  func.func @transform_6(%arg0: i32, %arg1: i32) -> (i32, i32) {
    %c0_i32 = arith.constant 0 : i32
    %c0_i32_0 = arith.constant 0 : i32
    %c0_i32_1 = arith.constant 0 : i32
    return %c0_i32, %c0_i32_0 : i32, i32
  }
  func.func @transform_7(%arg0: i32, %arg1: i32) -> (i32, i32) {
    %c0_i32 = arith.constant 0 : i32
    %c0_i32_0 = arith.constant 0 : i32
    %c0_i32_1 = arith.constant 0 : i32
    return %c0_i32, %c0_i32_0 : i32, i32
  }
  func.func @transform_8(%arg0: i32, %arg1: i32) -> (i32, i32) {
    %c0_i32 = arith.constant 0 : i32
    %c0_i32_0 = arith.constant 0 : i32
    %c0_i32_1 = arith.constant 0 : i32
    return %c0_i32, %c0_i32_0 : i32, i32
  }
}

</mosaic_0001>

<bundles_post_ra>
// kernel: multihead_forward.3
= control target key start
LH: loop header
LB: loop body
LE: loop exit
PB: predicated region body
PF: predicated region fallthrough
CT: control target
= control target key end

     0   :  { %s955_s12 = smov 0   ;;  %s957_s13 = smov 0   ;;  %s1016_s0 = inlined_call_operand.vmem [shape: f32[2,4,256], index: 0, kind: input, shape index: {}]   ;;  %s1017_s1 = inlined_call_operand.vmem [shape: f32[12,4], index: 1, kind: input, shape index: {}]   ;;  %s1018_s2 = inlined_call_operand.vmem [shape: f32[12,1], index: 2, kind: input, shape index: {}]   ;;  %s1019_s3 = inlined_call_operand.vmem [shape: f32[2,12,256], index: 3, kind: output, shape index: {}]  }
   0x1   :  { %s959_s14 = smov 0  }
   0x2 LB: > { %s25_s15 = sadd.s32 1, %s927_s13  ;;  %p848_p0 = scmp.ge.s32.totalorder %s931_s14, 1  ;;  %s931_s14 = sphi %s959_s14, %s13_s14   ;;  %s927_s13 = sphi %s957_s13, %s1021_s13   ;;  %s923_s12 = sphi %s955_s12, %s1020_s12  }
   0x3   : > { %p27_p1 = scmp.ge.s32.totalorder %s25_s15, 2  ;;  %p158_p2 = scmp.lt.s32.totalorder %s931_s14, 3 }
   0x5   : > { %s1023_s15 = smov (%p27_p1, %s25_s15), 0  ;;  %p159_p3 = pnand %p848_p0, %p158_p2 }
   0x6   : > { %p191_p4 = scmp.lt.s32.totalorder (!%p159_p3), %s923_s12, 1  ;;  %v211_v0 = vld [vmem:[%s1017_s1] sm:$0xff] (!%p159_p3)  ;;  %vm227_vm0 = vcmask (!%p159_p3), 31744   ;;  %v933_v1 = vmov (!%p159_p3), 0.0   ;;  %v212_v3 = vld [vmem:[%s1017_s1 + $0x8] sm:$0xf] (!%p159_p3) }
   0x7   : > { %162 = sbr.rel (%p159_p3) target bundleno = 263 (0x107), region = 32  ;;  %305 = vmatprep.mubr.f32.mxu1 (!%p159_p3), %v933_v1  ;;  %568 = vmatprep.mubr.f32.mxu0 (!%p159_p3), %v933_v1  ;;  %v229_v2 = vsel (!%p159_p3), %vm227_vm0, %v211_v0, 0  ;;  %v213_v4 = vld [vmem:[%s1018_s2] sm:$0xff] (!%p159_p3)  ;;  %v232_v6 = vsel (!%p159_p3), %vm227_vm0, %v212_v3, 0  ;;  %v934_v7 = vmov (!%p159_p3), 0   ;;  %vm234_vm1 = vcmask (!%p159_p3), 1043456  }
   0x8   : > { %v306_v5 = vand.u32 (!%p159_p3), 4294901760, %v229_v2  ;;  %907 = vset.pattern.permute.xlu0 (!%p159_p3), %v934_v7  ;;  %v317_v8 = vand.u32 (!%p159_p3), 4294901760, %v232_v6  ;;  %v214_v10 = vld [vmem:[%s1018_s2 + $0x8] sm:$0xf] (!%p159_p3) }
   0x9   : > { %217 = vperm.xlu0 (!%p159_p3), %907, %v213_v4  }
   0xa   : > { %v307_v9 = vsub.f32 (!%p159_p3), %v229_v2, %v306_v5  ;;  %v318_v11 = vsub.f32 (!%p159_p3), %v232_v6, %v317_v8 }
   0xc   : > { %v308_v13 = vand.u32 (!%p159_p3), 4294901760, %v307_v9  ;;  %v319_v16 = vand.u32 (!%p159_p3), 4294901760, %v318_v11 }
   0xd   : > { %222 = vperm.xlu0 (!%p159_p3), %907, %v214_v10  }
   0xe   : > { %s1025_s12 = smov (!%p191_p4, %s923_s12), 1  ;;  %v309_v18 = vsub.f32 %v307_v9, %v308_v13  ;;  %v320_v23 = vsub.f32 %v318_v11, %v319_v16 }
   0xf   : > { %s855_s22 = sshll.u32 %s1025_s12, 3  ;;  %s856_s28 = sshll.u32 %s1025_s12, 5 }
  0x10   : > { %s198_s27 = scalar_lea.vmem %s1016_s0, %s855_s22  ;;  %v310_v22 = vand.u32 4294901760, %v309_v18  ;;  %v321_v26 = vand.u32 4294901760, %v320_v23  ;;  %s208_s4 = scalar_lea.vmem %s1019_s3, %s856_s28 }
  0x11   : > { %v210_v12 = vld [vmem:[%s198_s27] sm:$0xff] }
  0x12   : > { %v226_v14 = vcombine.high %v210_v12, %v210_v12  ;;  %v235_v15 = vsel %vm234_vm1, %v210_v12, 0 }
  0x13   : > { %v241_v17 = vand.u32 4294901760, %v235_v15 }
  0x14   : > { %v237_v19 = vsel %vm234_vm1, %v226_v14, 0 }
  0x15   : > { %v239_v20 = vand.u32 4294901760, %v237_v19  ;;  %v335_v21 = vsub.f32 %v235_v15, %v241_v17 }
  0x17   : > { %240 = vmatprep.subr.mxu1 %v239_v20  ;;  %503 = vmatprep.subr.mxu0 %v239_v20  ;;  %v329_v24 = vsub.f32 %v237_v19, %v239_v20  ;;  %v336_v25 = vand.u32 4294901760, %v335_v21 }
  0x18   : > { %242 = vmatpush1.msra.mxu1 %v241_v17  ;;  %505 = vmatpush1.msra.mxu0 %v241_v17 }
  0x19   : > { %311 = vmatmul.mubr.f32.vlgmr.msra.gmra.mrb[0].mxu1 %v310_v22  ;;  %572 = vmatmul.mubr.f32.vlgmr.msra.gmra.mrb[0].mxu0 %v308_v13  ;;  %v330_v27 = vand.u32 4294901760, %v329_v24  ;;  %v337_v28 = vsub.f32 %v335_v21, %v336_v25 }
  0x1a   : > { %316 = vmatprep.mubr.f32.mxu1 %v933_v1  ;;  %577 = vmatprep.mubr.f32.mxu0 %v933_v1 }
  0x1b   : > { %v331_v29 = vsub.f32 %v329_v24, %v330_v27  ;;  %590 = vmatprep.subr.mxu0 %v330_v27  ;;  %v338_v30 = vand.u32 4294901760, %v337_v28 }
  0x1c   : > { %594 = vmatpush1.msra.mxu0 %v336_v25 }
  0x1d   : > { %322 = vmatmul.mubr.f32.gmra.mrb[2].mxu1 %v321_v26  ;;  %581 = vmatmul.mubr.f32.gmra.mrb[2].mxu0 %v319_v16  ;;  %v332_v31 = vand.u32 4294901760, %v331_v29 }
  0x1e   : > { %402 = vmatprep.mubr.f32.mxu1 %v933_v1  ;;  %657 = vmatprep.mubr.f32.mxu0 %v933_v1 }
  0x1f   : > { %333 = vmatprep.subr.mxu1 %v332_v31  ;;  %673 = vmatprep.subr.mxu0 %v239_v20 }
  0x20   : > { %339 = vmatpush1.msra.mxu1 %v338_v30 }
  0x21   : > { %404 = vmatmul.mubr.f32.vlgmr.msra.gmra.mrb[0].mxu1 %v306_v5  ;;  %659 = vmatmul.mubr.f32.vlgmr.msra.gmra.mrb[0].mxu0 %v306_v5 }
  0x22   : > { %409 = vmatprep.mubr.f32.mxu1 %v933_v1  ;;  %664 = vmatprep.mubr.f32.mxu0 %v933_v1 }
  0x23   : > { %419 = vmatprep.subr.mxu1 %v329_v24  ;;  %675 = vmatpush1.msra.mxu0 %v241_v17 }
  0x24   : > { %422 = vmatpush1.msra.mxu1 %v335_v21 }
  0x25   : > { %411 = vmatmul.mubr.f32.gmra.mrb[2].mxu1 %v317_v8  ;;  %666 = vmatmul.mubr.f32.gmra.mrb[2].mxu0 %v317_v8 }
  0x26   : > { %485 = vmatprep.mubr.f32.mxu1 %v933_v1  ;;  %738 = vmatprep.mubr.f32.mxu0 %v933_v1 }
  0x29   : > { %488 = vmatmul.mubr.f32.vlgmr.msra.gmra.mrb[0].mxu1 %v307_v9  ;;  %740 = vmatmul.mubr.f32.vlgmr.msra.gmra.mrb[0].mxu0 %v306_v5 }
  0x2a   : > { %493 = vmatprep.mubr.f32.mxu1 %v933_v1  ;;  %745 = vmatprep.mubr.f32.mxu0 %v933_v1 }
  0x2d   : > { %496 = vmatmul.mubr.f32.gmra.mrb[2].mxu1 %v318_v11  ;;  %747 = vmatmul.mubr.f32.gmra.mrb[2].mxu0 %v317_v8 }
  0x88   : > { %v218_v32 = vpop.permute.xlu0 %217 }
  0x8c   : > { %v223_v40 = vpop.permute.xlu0 %222 }
  0xfc   : > { %v489_v33 = vpop.f32.mrb[0].mxu1  ;;  %v741_v34 = vpop.f32.mrb[0].mxu0 }
  0xfd   : > { %v857_v35 = vadd.f32 %v489_v33, %v218_v32  ;;  %v491_v36 = vpop.f32.mrb[1].mxu1  ;;  %v743_v37 = vpop.f32.mrb[1].mxu0 }
  0xfe   : > { %v859_v38 = vadd.f32 %v491_v36, %v218_v32 }
  0xff   : > { %v858_v39 = vadd.f32 %v857_v35, %v741_v34 }
 0x100   : > { %v860_v41 = vadd.f32 %v859_v38, %v743_v37  ;;  %v497_v42 = vpop.f32.mrb[2].mxu1  ;;  %v748_v43 = vpop.f32.mrb[2].mxu0 }
 0x101   : > { %753 = vst [vmem:[%s208_s4] sm:$0xff] %v858_v39  ;;  %v861_v44 = vadd.f32 %v497_v42, %v223_v40  ;;  %v499_v45 = vpop.f32.mrb[3].mxu1  ;;  %v750_v46 = vpop.f32.mrb[3].mxu0 }
 0x102   : > { %754 = vst [vmem:[%s208_s4 + $0x8] sm:$0xff] %v860_v41  ;;  %v863_v47 = vadd.f32 %v499_v45, %v223_v40 }
 0x103   : > { %v862_v48 = vadd.f32 %v861_v44, %v748_v43 }
 0x104   : > { %v864_v49 = vadd.f32 %v863_v47, %v750_v46 }
 0x105   : > { %755 = vst [vmem:[%s208_s4 + $0x10] sm:$0xf] %v862_v48 }
 0x106   : > { %756 = vst [vmem:[%s208_s4 + $0x18] sm:$0xf] %v864_v49 }
 0x107 PF: > { %s13_s14 = sadd.s32 1, %s931_s14   ;;  %s1020_s12 = smov %s927_s13 }
 0x108   : > { %p10_p5 = scmp.ge.s32.totalorder %s13_s14, 4   ;;  %s1021_s13 = smov %s1023_s15 }
 0x10a   :  { %12 = sbr.rel (!%p10_p5) target bundleno = 2 (0x2), region = 62 }

// kernel: multihead_forward.2
= control target key start
LH: loop header
LB: loop body
LE: loop exit
PB: predicated region body
PF: predicated region fallthrough
CT: control target
= control target key end

     0   :  { %s3881_s27 = smov 0   ;;  %s3883_s28 = smov 0   ;;  %s4167_s0 = inlined_call_operand.vmem [shape: f32[2,4,256], index: 0, kind: input, shape index: {}]   ;;  %s4168_s1 = inlined_call_operand.vmem [shape: f32[32,4], index: 1, kind: input, shape index: {}]   ;;  %s4169_s2 = inlined_call_operand.vmem [shape: f32[32,1], index: 2, kind: input, shape index: {}]   ;;  %s4170_s3 = inlined_call_operand.vmem [shape: f32[32,1], index: 3, kind: input, shape index: {}]   ;;  %s4171_s4 = inlined_call_operand.vmem [shape: f32[32,1], index: 4, kind: input, shape index: {}]   ;;  %s4172_s5 = inlined_call_operand.vmem [shape: f32[12,32], index: 5, kind: input, shape index: {}]   ;;  %s4173_s6 = inlined_call_operand.vmem [shape: f32[12,1], index: 6, kind: input, shape index: {}]   ;;  %s4174_s7 = inlined_call_operand.vmem [shape: f32[12,4], index: 7, kind: output, shape index: {0}]   ;;  %s4175_s8 = inlined_call_operand.vmem [shape: f32[12,1], index: 8, kind: output, shape index: {1}]  }
   0x1   :  { %s3885_s29 = smov 0  }
   0x2 LB: > { %s31_s30 = sadd.s32 1, %s3828_s28  ;;  %p3245_p0 = scmp.ge.s32.totalorder %s3832_s29, 1  ;;  %s3832_s29 = sphi %s3885_s29, %s19_s29   ;;  %s3828_s28 = sphi %s3883_s28, %s4177_s28   ;;  %s3824_s27 = sphi %s3881_s27, %s4176_s27  }
   0x3   : > { %p33_p1 = scmp.ge.s32.totalorder %s31_s30, 2  ;;  %p274_p2 = scmp.lt.s32.totalorder %s3832_s29, 3 }
   0x5   : > { %s4179_s30 = smov (%p33_p1, %s31_s30), 0  ;;  %p275_p3 = pnand %p3245_p0, %p274_p2 }
   0x6   : > { %p308_p4 = scmp.lt.s32.totalorder (!%p275_p3), %s3824_s27, 1  ;;  %p317_p5 = scmp.eq.s32.totalorder (!%p275_p3), %s3824_s27, 0 }
   0x7   : > { %278 = sbr.rel (%p275_p3) target bundleno = 1103 (0x44f), region = 48  ;;  %p321_p6 = scmp.eq.s32.totalorder (!%p275_p3), %s3824_s27, 1 }
   0xe   : > { %s309_s9 = scalar_select %p308_p4, %s3824_s27, 1 }
   0xf   : > { %325 = sbr.rel (!%p317_p5) target bundleno = 22 (0x16), region = 52  ;;  %vm326_vm0 = vcmask (%p317_p5), 3072   ;;  %vm328_vm1 = vcmask (%p317_p5), 27648   ;;  %v3834_v0 = vmov (%p317_p5), 0.0  }
  0x10   : > { %s3252_s10 = sshll.u32 %s309_s9, 3  ;;  %327 = vst.msk [vmem:[#allocation2] sm:$0xf] (%p317_p5), %vm326_vm0, %v3834_v0 }
  0x11   : > { %s315_s13 = scalar_lea.vmem %s4167_s0, %s3252_s10  ;;  %329 = vst.msk [vmem:[#allocation3] sm:$0xf] (%p317_p5), %vm328_vm1, %v3834_v0 }
  0x16 PF: > { %v330_v1 = vld [vmem:[%s315_s13] sm:$0xff]  ;;  %vm335_vm2 = vcmask 1043456   ;;  %vm342_vm3 = vcmask 3072   ;;  %vm818_vm4 = vcmask 27648   ;;  %vm844_vm5 = vcmask (%p321_p6), 31744   ;;  %v3922_v40 = vld [vmem:[%s4168_s1 + $0x8] sm:$0xff] (%p321_p6) }
  0x17   : > { %v333_v2 = vcombine.high %v330_v1, %v330_v1  ;;  %v347_v3 = vand.u32 4294901760, %v330_v1  ;;  %v336_v4 = vsel %vm335_vm2, %v330_v1, 0.0  ;;  %v331_v16 = vld [vmem:[#allocation2] sm:$0xf]  ;;  %v849_v43 = vsel (%p321_p6), %vm844_vm5, %v3922_v40, 0  ;;  %v3932_v44 = vld [vmem:[%s4168_s1 + $0x10] sm:$0xff] (%p321_p6) }
  0x18   : > { %v344_v33 = vld [vmem:[#allocation3] sm:$0xf]  ;;  %v3937_v45 = vld [vmem:[%s4168_s1 + $0x18] sm:$0xff] (%p321_p6)  ;;  %v3943_v48 = vand.u32 (%p321_p6), 4294901760, %v849_v43  ;;  %v852_v49 = vsel (%p321_p6), %vm844_vm5, %v3932_v44, 0  ;;  %vm2114_vm6 = vcmask (%p321_p6), 261120  }
  0x19   : > { %v345_v5 = vand.u32 4294901760, %v333_v2  ;;  %v418_v6 = vsub.f32 %v330_v1, %v347_v3  ;;  %v337_v7 = vsel %vm335_vm2, %v333_v2, 0.0  ;;  %v3917_v39 = vld [vmem:[%s4168_s1] sm:$0xff] (%p321_p6)  ;;  %v3947_v51 = vand.u32 (%p321_p6), 4294901760, %v852_v49 }
  0x1a   : > { %v338_v8 = vadd.f32 %v337_v7, %v336_v4  ;;  %v846_v42 = vsel (%p321_p6), %vm844_vm5, %v3917_v39, 0  ;;  %v855_v52 = vsel (%p321_p6), %vm844_vm5, %v3937_v45, 0  ;;  %v937_v55 = vsub.f32 (%p321_p6), %v849_v43, %v3943_v48  ;;  %v4033_v43 = vld [vmem:[%s4169_s2 + $0x8] sm:$0xff] (%p321_p6) }
  0x1b   : > { %346 = vmatprep.subr.mxu0 %v345_v5  ;;  %v412_v9 = vsub.f32 %v333_v2, %v345_v5  ;;  %v419_v10 = vand.u32 4294901760, %v418_v6  ;;  %502 = vmatprep.mubr.f32.mxu1 %v345_v5  ;;  %v3941_v47 = vand.u32 (%p321_p6), 4294901760, %v846_v42  ;;  %v3956_v57 = vand.u32 (%p321_p6), 4294901760, %v855_v52 }
  0x1c   : > { %348 = vmatpush1.xpose.msra.mxu0 %v347_v3  ;;  %339 = vadd.xlane.f32.xlu0 %v338_v8  ;;  %v947_v58 = vsub.f32 (%p321_p6), %v852_v49, %v3947_v51  ;;  %v3962_v61 = vand.u32 (%p321_p6), 4294901760, %v937_v55  ;;  %v1436_v49 = vmul.f32 (%p321_p6), 512.0, %v4033_v43  ;;  %vm3191_vm7 = vcmask (%p321_p6), 7168  }
  0x1d   : > { %v413_v11 = vand.u32 4294901760, %v412_v9  ;;  %v420_v12 = vsub.f32 %v418_v6, %v419_v10  ;;  %511 = vmatprep.subr.mxu0 %v412_v9  ;;  %v927_v54 = vsub.f32 (%p321_p6), %v846_v42, %v3941_v47  ;;  %v957_v63 = vsub.f32 (%p321_p6), %v855_v52, %v3956_v57  ;;  %v4028_v42 = vld [vmem:[%s4169_s2] sm:$0xff] (%p321_p6)  ;;  %v4047_v52 = vld [vmem:[%s4169_s2 + $0x18] sm:$0xff] (%p321_p6) }
  0x1e   : > { %v948_v0 = vand.u32 (%p321_p6), 4294901760, %v947_v58 }
  0x1f   : > { %v414_v13 = vsub.f32 %v412_v9, %v413_v11  ;;  %v421_v14 = vand.u32 4294901760, %v420_v12  ;;  %v928_v60 = vand.u32 (%p321_p6), 4294901760, %v927_v54 }
  0x21   : > { %v415_v15 = vand.u32 4294901760, %v414_v13  ;;  %v929_v2 = vsub.f32 (%p321_p6), %v927_v54, %v928_v60 }
  0x23   : > { %432 = vmatprep.subr.mxu1 %v415_v15  ;;  %416 = vmatprep.mubr.f32.mxu0 %v415_v15  ;;  %v930_v8 = vand.u32 (%p321_p6), 4294901760, %v929_v2 }
  0x24   : > { %438 = vmatpush1.xpose.msra.mxu1 %v421_v14  ;;  %422 = vmatmul.mubr.f32.vlgmr.msra.gmra.mrb[0].mxu0 %v421_v14 }
  0x25   : > { %514 = vmatpush1.xpose.msra.mxu0 %v418_v6  ;;  %588 = vmatprep.subr.mxu1 %v345_v5 }
  0x26   : > { %579 = vmatprep.mubr.f32.mxu0 %v412_v9  ;;  %668 = vmatprep.subr.mxu0 %v413_v11 }
  0x27   : > { %504 = vmatmul.mubr.f32.vlgmr.msra.gmra.mrb[0].mxu1 %v347_v3 }
  0x28   : > { %590 = vmatpush1.xpose.msra.mxu1 %v347_v3  ;;  %582 = vmatmul.mubr.f32.vlgmr.msra.gmra.mrb[2].mxu0 %v418_v6  ;;  %v949_v6 = vsub.f32 (%p321_p6), %v947_v58, %v948_v0 }
  0x29   : > { %656 = vmatprep.mubr.f32.mxu1 %v413_v11  ;;  %672 = vmatpush1.xpose.msra.mxu0 %v419_v10 }
  0x2a   : > { %744 = vmatprep.subr.mxu1 %v345_v5  ;;  %736 = vmatprep.mubr.f32.mxu0 %v345_v5  ;;  %v950_v12 = vand.u32 (%p321_p6), 4294901760, %v949_v6 }
  0x2b   : > { %660 = vmatmul.mubr.f32.vlgmr.msra.gmra.mrb[2].mxu1 %v419_v10 }
  0x2c   : > { %746 = vmatpush1.xpose.msra.mxu1 %v347_v3  ;;  %738 = vmatmul.mubr.f32.vlgmr.msra.gmra.mrb[4].mxu0 %v347_v3 }
  0x2d   : > { %810 = vmatprep.mubr.f32.mxu1 %v345_v5  ;;  %v958_v5 = vand.u32 (%p321_p6), 4294901760, %v957_v63  ;;  %3389 = vmatprep.mubr.f32.mxu0 (%p321_p6), %v930_v8 }
  0x2f   : > { %812 = vmatmul.mubr.f32.vlgmr.msra.gmra.mrb[4].mxu1 %v347_v3  ;;  %v939_v3 = vsub.f32 (%p321_p6), %v937_v55, %v3962_v61  ;;  %v959_v11 = vsub.f32 (%p321_p6), %v957_v63, %v958_v5 }
  0x30   : > { %3437 = vmatprep.mubr.f32.mxu1 (%p321_p6), %v930_v8 }
  0x31   : > { %v940_v9 = vand.u32 (%p321_p6), 4294901760, %v939_v3  ;;  %v960_v14 = vand.u32 (%p321_p6), 4294901760, %v959_v11  ;;  %v2055_v3 = vmul.f32 (%p321_p6), %v1436_v49, %v4033_v43 }
  0xa9   : > { %v340_v17 = vpop.xlane.xlu0 %339 }
  0xaa   : > { %v341_v18 = vadd.f32 %v340_v17, %v331_v16 }
  0xac   : > { %343 = vst.msk [vmem:[#allocation2] sm:$0xf] %vm342_vm3, %v341_v18 }
  0xb3   : > { %v822_v50 = vld [vmem:[#allocation2] sm:$0xf] (%p321_p6) }
  0xb4   : > { %v858_v53 = vsel (%p321_p6), %vm335_vm2, %v822_v50, 0 }
  0xb5   : > { %v3960_v59 = vand.u32 (%p321_p6), 4294901760, %v858_v53 }
  0xb7   : > { %3387 = vmatprep.subr.mxu0 (%p321_p6), %v3960_v59  ;;  %v968_v1 = vsub.f32 (%p321_p6), %v858_v53, %v3960_v59  ;;  %v2043_v53 = vmul.f32 (%p321_p6), 2.0, %v4033_v43 }
  0xb8   : > { %3388 = vmatpush3.msra.mxu0 (%p321_p6), %v3960_v59 }
  0xb9   : > { %v969_v7 = vand.u32 (%p321_p6), 4294901760, %v968_v1 }
  0xbb   : > { %v970_v13 = vsub.f32 (%p321_p6), %v968_v1, %v969_v7 }
  0xbd   : > { %v971_v15 = vand.u32 (%p321_p6), 4294901760, %v970_v13 }
  0xbf   : > { %3395 = vmatprep.subr.mxu0 (%p321_p6), %v971_v15 }
  0xf7   : > { %v423_v19 = vpop.f32.mrb[0].mxu0 }
  0xf8   : > { %v425_v20 = vpop.f32.mrb[1].mxu0  ;;  %3390 = vmatmul.mubr.f32.vlgmr.msra.gmra.mrb[0].mxu0 (%p321_p6), %v940_v9 }
  0xf9   : > { %3392 = vmatprep.mubr.f32.mxu0 (%p321_p6), %v950_v12  ;;  %3396 = vmatpush3.msra.mxu0 (%p321_p6), %v971_v15 }
  0xfa   : > { %v505_v21 = vpop.f32.mrb[0].mxu1  ;;  %3403 = vmatprep.subr.mxu0 (%p321_p6), %v968_v1 }
  0xfb   : > { %v506_v22 = vadd.f32 %v505_v21, %v423_v19  ;;  %v507_v23 = vpop.f32.mrb[1].mxu1  ;;  %v583_v24 = vpop.f32.mrb[2].mxu0 }
  0xfc   : > { %v585_v25 = vpop.f32.mrb[3].mxu0  ;;  %3393 = vmatmul.mubr.f32.gmra.mrb[2].mxu0 (%p321_p6), %v960_v14 }
  0xfd   : > { %v584_v26 = vadd.f32 %v583_v24, %v506_v22  ;;  %3397 = vmatprep.mubr.f32.mxu0 (%p321_p6), %v3941_v47 }
  0xfe   : > { %v661_v27 = vpop.f32.mrb[2].mxu1 }
  0xff   : > { %v662_v28 = vadd.f32 %v661_v27, %v584_v26  ;;  %v663_v29 = vpop.f32.mrb[3].mxu1  ;;  %v739_v30 = vpop.f32.mrb[4].mxu0 }
 0x100   : > { %v741_v31 = vpop.f32.mrb[5].mxu0  ;;  %3398 = vmatmul.mubr.f32.vlgmr.msra.gmra.mrb[0].mxu0 (%p321_p6), %v3943_v48 }
 0x101   : > { %v740_v32 = vadd.f32 %v739_v30, %v662_v28  ;;  %821 = sbr.rel (!%p321_p6) target bundleno = 1103 (0x44f), region = 56  ;;  %3400 = vmatprep.mubr.f32.mxu0 (%p321_p6), %v3947_v51  ;;  %3404 = vmatpush3.msra.mxu0 (%p321_p6), %v968_v1 }
 0x102   : > { %v813_v34 = vpop.f32.mrb[4].mxu1  ;;  %3411 = vmatprep.subr.mxu0 (%p321_p6), %v3960_v59 }
 0x103   : > { %v814_v35 = vadd.f32 %v813_v34, %v740_v32  ;;  %v815_v36 = vpop.f32.mrb[5].mxu1  ;;  %v3835_v32 = vmov (%p321_p6), 0  }
 0x104   : > { %3401 = vmatmul.mubr.f32.gmra.mrb[2].mxu0 (%p321_p6), %v3956_v57  ;;  %3800 = vset.pattern.permute.xlu0 (%p321_p6), %v3835_v32 }
 0x105   : > { %v817_v37 = vadd.f32 %v814_v35, %v344_v33  ;;  %3405 = vmatprep.mubr.f32.mxu0 (%p321_p6), %v927_v54  ;;  %3801 = vset.pattern.permute.xlu1 (%p321_p6), %v3835_v32  ;;  %v840_v33 = vld [vmem:[%s4172_s5] sm:$0xff] (%p321_p6) }
 0x106   : > { %v2116_v34 = vsel (%p321_p6), %vm2114_vm6, %v840_v33, 0 }
 0x107   : > { %819 = vst.msk [vmem:[#allocation3] sm:$0xf] %vm818_vm4, %v817_v37  ;;  %v4015_v35 = vand.u32 (%p321_p6), 4294901760, %v2116_v34 }
 0x108   : > { %3406 = vmatmul.mubr.f32.vlgmr.msra.gmra.mrb[0].mxu0 %v937_v55 }
 0x109   : > { %3408 = vmatprep.mubr.f32.mxu0 %v947_v58  ;;  %3412 = vmatpush3.msra.mxu0 %v3960_v59  ;;  %v4018_v36 = vsub.f32 %v2116_v34, %v4015_v35 }
 0x10a   : > { %3419 = vmatprep.subr.mxu0 %v969_v7 }
 0x10b   : > { %v4021_v37 = vand.u32 4294901760, %v4018_v36 }
 0x10c   : > { %3409 = vmatmul.mubr.f32.gmra.mrb[2].mxu0 %v957_v63 }
 0x10d   : > { %3413 = vmatprep.mubr.f32.mxu0 %v928_v60 }
 0x10e   : > { %v823_v38 = vld [vmem:[#allocation3] sm:$0xf] }
 0x10f   : > { %v1449_v41 = vsel %vm335_vm2, %v823_v38, 0  ;;  %v2193_v38 = vsub.f32 %v4018_v36, %v4021_v37 }
 0x110   : > { %v3939_v46 = vand.u32 4294901760, %v1449_v41  ;;  %3414 = vmatmul.mubr.f32.vlgmr.msra.gmra.mrb[0].mxu0 %v3962_v61 }
 0x111   : > { %3416 = vmatprep.mubr.f32.mxu0 %v948_v0  ;;  %3420 = vmatpush3.msra.mxu0 %v969_v7 }
 0x112   : > { %3435 = vmatprep.subr.mxu1 %v3939_v46  ;;  %v1559_v56 = vsub.f32 %v1449_v41, %v3939_v46  ;;  %3427 = vmatprep.subr.mxu0 %v3960_v59  ;;  %v2194_v41 = vand.u32 4294901760, %v2193_v38 }
 0x113   : > { %3436 = vmatpush3.msra.mxu1 %v3939_v46 }
 0x114   : > { %v1560_v62 = vand.u32 4294901760, %v1559_v56  ;;  %3438 = vmatmul.mubr.f32.vlgmr.msra.gmra.mrb[0].mxu1 %v940_v9  ;;  %3417 = vmatmul.mubr.f32.gmra.mrb[2].mxu0 %v958_v5 }
 0x115   : > { %3440 = vmatprep.mubr.f32.mxu1 %v950_v12  ;;  %3421 = vmatprep.mubr.f32.mxu0 %v3941_v47 }
 0x116   : > { %v1561_v4 = vsub.f32 %v1559_v56, %v1560_v62 }
 0x118   : > { %v1562_v10 = vand.u32 4294901760, %v1561_v4  ;;  %3441 = vmatmul.mubr.f32.gmra.mrb[2].mxu1 %v960_v14  ;;  %3422 = vmatmul.mubr.f32.vlgmr.msra.gmra.mrb[0].mxu0 %v3943_v48 }
 0x119   : > { %3445 = vmatprep.mubr.f32.mxu1 %v3941_v47  ;;  %3424 = vmatprep.mubr.f32.mxu0 %v3947_v51 }
 0x11a   : > { %3443 = vmatprep.subr.mxu1 %v1562_v10  ;;  %3428 = vmatpush3.msra.mxu0 %v3960_v59 }
 0x11b   : > { %3444 = vmatpush3.msra.mxu1 %v1562_v10 }
 0x11c   : > { %3451 = vmatprep.subr.mxu1 %v1559_v56  ;;  %3446 = vmatmul.mubr.f32.vlgmr.msra.gmra.mrb[0].mxu1 %v3943_v48 }
 0x11d   : > { %3452 = vmatpush3.msra.mxu1 %v1559_v56  ;;  %3448 = vmatprep.mubr.f32.mxu1 %v3947_v51 }
 0x11e   : > { %3459 = vmatprep.subr.mxu1 %v3939_v46  ;;  %3425 = vmatmul.mubr.f32.gmra.mrb[2].mxu0 %v3956_v57 }
 0x11f   : > { %3429 = vmatprep.mubr.f32.mxu0 %v3941_v47 }
 0x120   : > { %3449 = vmatmul.mubr.f32.gmra.mrb[2].mxu1 %v3956_v57 }
 0x121   : > { %3453 = vmatprep.mubr.f32.mxu1 %v927_v54 }
 0x122   : > { %3430 = vmatmul.mubr.f32.vlgmr.msra.gmra.mrb[0].mxu0 %v3943_v48 }
 0x123   : > { %3432 = vmatprep.mubr.f32.mxu0 %v3947_v51 }
 0x124   : > { %3454 = vmatmul.mubr.f32.vlgmr.msra.gmra.mrb[0].mxu1 %v937_v55 }
 0x125   : > { %3460 = vmatpush3.msra.mxu1 %v3939_v46  ;;  %3456 = vmatprep.mubr.f32.mxu1 %v947_v58  ;;  %v1438_v58 = vmul.f32 512.0, %v4047_v52 }
 0x126   : > { %3467 = vmatprep.subr.mxu1 %v1560_v62  ;;  %3433 = vmatmul.mubr.f32.gmra.mrb[2].mxu0 %v3956_v57 }
 0x127   : > { %3491 = vmatprep.mubr.f32.mxu0 %v2194_v41 }
 0x128   : > { %3457 = vmatmul.mubr.f32.gmra.mrb[2].mxu1 %v957_v63 }
 0x129   : > { %3461 = vmatprep.mubr.f32.mxu1 %v928_v60 }
 0x12c   : > { %3462 = vmatmul.mubr.f32.vlgmr.msra.gmra.mrb[0].mxu1 %v3962_v61 }
 0x12d   : > { %3468 = vmatpush3.msra.mxu1 %v1560_v62  ;;  %3464 = vmatprep.mubr.f32.mxu1 %v948_v0  ;;  %v2045_v0 = vmul.f32 2.0, %v4047_v52 }
 0x12e   : > { %3475 = vmatprep.subr.mxu1 %v3939_v46 }
 0x130   : > { %3465 = vmatmul.mubr.f32.gmra.mrb[2].mxu1 %v958_v5 }
 0x131   : > { %3469 = vmatprep.mubr.f32.mxu1 %v3941_v47 }
 0x134   : > { %3470 = vmatmul.mubr.f32.vlgmr.msra.gmra.mrb[0].mxu1 %v3943_v48 }
 0x135   : > { %3476 = vmatpush3.msra.mxu1 %v3939_v46  ;;  %3472 = vmatprep.mubr.f32.mxu1 %v3947_v51  ;;  %v1435_v46 = vmul.f32 512.0, %v4028_v42 }
 0x137   : > { %v2054_v56 = vmul.f32 %v1435_v46, %v4028_v42 }
 0x138   : > { %3473 = vmatmul.mubr.f32.gmra.mrb[2].mxu1 %v3956_v57 }
 0x139   : > { %3477 = vmatprep.mubr.f32.mxu1 %v3941_v47  ;;  %v4039_v47 = vld [vmem:[%s4169_s2 + $0x10] sm:$0xff] }
 0x13a   : > { %v1437_v50 = vmul.f32 512.0, %v4039_v47  ;;  %v2044_v55 = vmul.f32 2.0, %v4039_v47 }
 0x13c   : > { %3478 = vmatmul.mubr.f32.vlgmr.msra.gmra.mrb[0].mxu1 %v3943_v48  ;;  %v2042_v48 = vmul.f32 2.0, %v4028_v42  ;;  %v2056_v4 = vmul.f32 %v1437_v50, %v4039_v47 }
 0x13d   : > { %3480 = vmatprep.mubr.f32.mxu1 %v3947_v51 }
 0x140   : > { %3481 = vmatmul.mubr.f32.gmra.mrb[2].mxu1 %v3956_v57 }
 0x141   : > { %3557 = vmatprep.mubr.f32.mxu1 %v2194_v41 }
 0x1f5   : > { %v3431_v19 = vpop.f32.mrb[0].mxu0 }
 0x1f6   : > { %v1413_v20 = vpop.f32.mrb[1].mxu0  ;;  %v1440_v57 = vadd.f32 %v3431_v19, %v1436_v49  ;;  %v2047_v63 = vmul.f32 %v3431_v19, %v2043_v53 }
 0x1f7   : > { %v1439_v51 = vadd.f32 %v1435_v46, %v1413_v20  ;;  %v2046_v54 = vmul.f32 %v2042_v48, %v1413_v20 }
 0x1f8   : > { %v4056_v5 = vmul.f32 0.001953125, %v1440_v57  ;;  %v836_v57 = vld [vmem:[%s4171_s4] sm:$0xff] }
 0x1f9   : > { %v3434_v26 = vpop.f32.mrb[2].mxu0  ;;  %v1444_v61 = vmul.f32 0.001953125, %v1439_v51  ;;  %v832_v51 = vld [vmem:[%s4170_s3] sm:$0xff] }
 0x1fa   : > { %v1425_v27 = vpop.f32.mrb[3].mxu0  ;;  %v1442_v6 = vadd.f32 %v3434_v26, %v1438_v58  ;;  %v2049_v14 = vmul.f32 %v3434_v26, %v2045_v0  ;;  %v2067_v19 = vmul.f32 %v4056_v5, %v4056_v5 }
 0x1fb   : > { %v1441_v59 = vadd.f32 %v1437_v50, %v1425_v27  ;;  %v2048_v1 = vmul.f32 %v2044_v55, %v1425_v27  ;;  %v2066_v10 = vmul.f32 %v1444_v61, %v1444_v61  ;;  %v841_v50 = vld [vmem:[%s4172_s5 + $0x8] sm:$0xf]  ;;  %v2651_v55 = vsub.f32 %v4028_v42, %v1444_v61 }
 0x1fc   : > { %v1447_v20 = vmul.f32 0.001953125, %v1442_v6  ;;  %v2119_v53 = vsel %vm2114_vm6, %v841_v50, 0  ;;  %v2652_v42 = vsub.f32 %v4033_v43, %v4056_v5  ;;  %v835_v6 = vld [vmem:[%s4170_s3 + $0x18] sm:$0xff]  ;;  %v838_v5 = vld [vmem:[%s4171_s4 + $0x10] sm:$0xff] }
 0x1fd   : > { %v4058_v7 = vmul.f32 0.001953125, %v1441_v59  ;;  %v4079_v59 = vand.u32 4294901760, %v2119_v53 }
 0x20f   : > { %v3479_v16 = vpop.f32.mrb[0].mxu1 }
 0x210   : > { %v2004_v17 = vpop.f32.mrb[1].mxu1  ;;  %v2027_v21 = vmul.f32 %v3479_v16, %v3922_v40 }
 0x211   : > { %v2026_v18 = vmul.f32 %v2004_v17, %v3917_v39 }
 0x212   : > { %v2033_v29 = vsel %vm844_vm5, %v2027_v21, 0.0  ;;  %v2068_v21 = vmul.f32 %v4058_v7, %v4058_v7 }
 0x213   : > { %v3482_v22 = vpop.f32.mrb[2].mxu1  ;;  %v2030_v23 = vsel %vm844_vm5, %v2026_v18, 0.0  ;;  %v2057_v18 = vmul.f32 %v1438_v58, %v4047_v52  ;;  %v833_v58 = vld [vmem:[%s4170_s3 + $0x8] sm:$0xff] }
 0x214   : > { %2031 = vadd.xlane.f32.xlu0 %v2030_v23  ;;  %v2016_v24 = vpop.f32.mrb[3].mxu1  ;;  %v2029_v28 = vmul.f32 %v3482_v22, %v3937_v45 }
 0x215   : > { %v2028_v25 = vmul.f32 %v2016_v24, %v3932_v44 }
 0x216   : > { %v2039_v31 = vsel %vm844_vm5, %v2029_v28, 0.0 }
 0x217   : > { %v2036_v30 = vsel %vm844_vm5, %v2028_v25, 0.0 }
 0x218   : > { %2034 = vadd.xlane.f32.xlu0 %v2033_v29  ;;  %2037 = vadd.xlane.f32.xlu1 %v2036_v30 }
 0x21c   : > { %2040 = vadd.xlane.f32.xlu1 %v2039_v31  ;;  %v2069_v31 = vmul.f32 %v1447_v20, %v1447_v20 }
 0x2a1   : > { %v2032_v60 = vpop.xlane.xlu0 %2031 }
 0x2a2   : > { %v2050_v62 = vadd.f32 %v2046_v54, %v2032_v60 }
 0x2a4   : > { %v2058_v2 = vadd.f32 %v2054_v56, %v2050_v62  ;;  %v834_v62 = vld [vmem:[%s4170_s3 + $0x10] sm:$0xff] }
 0x2a5   : > { %v2035_v8 = vpop.xlane.xlu0 %2034  ;;  %v2038_v9 = vpop.xlane.xlu1 %2037 }
 0x2a6   : > { %v2062_v11 = vmul.f32 0.001953125, %v2058_v2  ;;  %v2051_v12 = vadd.f32 %v2047_v63, %v2035_v8  ;;  %v2052_v13 = vadd.f32 %v2048_v1, %v2038_v9  ;;  %v2653_v2 = vsub.f32 %v4039_v47, %v4058_v7 }
 0x2a7   : > { %v4095_v8 = vsub.f32 %v2119_v53, %v4079_v59 }
 0x2a8   : > { %v2070_v15 = vsub.f32 %v2062_v11, %v2066_v10  ;;  %v2059_v16 = vadd.f32 %v2055_v3, %v2051_v12  ;;  %v2060_v17 = vadd.f32 %v2056_v4, %v2052_v13  ;;  %v837_v3 = vld [vmem:[%s4171_s4 + $0x8] sm:$0xff]  ;;  %v2654_v10 = vsub.f32 %v4047_v52, %v1447_v20 }
 0x2a9   : > { %v2041_v22 = vpop.xlane.xlu1 %2040 }
 0x2aa   : > { %v2074_v23 = vmax.f32 %v2070_v15, 0.0  ;;  %v2063_v24 = vmul.f32 0.001953125, %v2059_v16  ;;  %v2064_v25 = vmul.f32 0.001953125, %v2060_v17  ;;  %v2053_v27 = vadd.f32 %v2049_v14, %v2041_v22  ;;  %v839_v15 = vld [vmem:[%s4171_s4 + $0x18] sm:$0xff] }
 0x2ab   : > { %v4105_v16 = vand.u32 4294901760, %v4095_v8 }
 0x2ac   : > { %v2078_v28 = vadd.f32 1e-05, %v2074_v23  ;;  %v2071_v29 = vsub.f32 %v2063_v24, %v2067_v19  ;;  %v2072_v26 = vsub.f32 %v2064_v25, %v2068_v21  ;;  %v2061_v30 = vadd.f32 %v2057_v18, %v2053_v27 }
 0x2ad   : > { %v2203_v25 = vsub.f32 %v4095_v8, %v4105_v16 }
 0x2ae   : > { %3802 = vrsqrt.f32 %v2078_v28  ;;  %v2075_v32 = vmax.f32 %v2071_v29, 0.0  ;;  %v2076_v33 = vmax.f32 %v2072_v26, 0.0  ;;  %v2065_v34 = vmul.f32 0.001953125, %v2061_v30 }
 0x2b0   : > { %v2079_v38 = vadd.f32 1e-05, %v2075_v32  ;;  %v2080_v41 = vadd.f32 1e-05, %v2076_v33  ;;  %v2073_v46 = vsub.f32 %v2065_v34, %v2069_v31 }
 0x2b2   : > { %3804 = vrsqrt.f32 %v2079_v38  ;;  %v2077_v48 = vmax.f32 %v2073_v46, 0.0  ;;  %v4109_v38 = vand.u32 4294901760, %v2203_v25 }
 0x2b3   : > { %3806 = vrsqrt.f32 %v2080_v41 }
 0x2b4   : > { %v2081_v49 = vadd.f32 1e-05, %v2077_v48 }
 0x2b6   : > { %3808 = vrsqrt.f32 %v2081_v49 }
 0x2b8   : > { %v3803_v54 = vpop.eup %3802 }
 0x2b9   : > { %v2086_v56 = vmul.f32 %v3803_v54, %v832_v51 }
 0x2bb   : > { %2092 = vperm.xlu0 %3800, %v2086_v56   ;;  %v2655_v60 = vmul.f32 %v2651_v55, %v2086_v56 }
 0x2bc   : > { %v3805_v63 = vpop.eup %3804 }
 0x2bd   : > { %v3807_v0 = vpop.eup %3806  ;;  %v2659_v61 = vadd.f32 %v2655_v60, %v836_v57  ;;  %v2087_v1 = vmul.f32 %v3805_v63, %v833_v58 }
 0x2be   : > { %v2088_v4 = vmul.f32 %v3807_v0, %v834_v62 }
 0x2bf   : > { %v2664_v9 = vand.u32 4294901760, %v2659_v61  ;;  %2097 = vperm.xlu1 %3801, %v2087_v1   ;;  %v2656_v43 = vmul.f32 %v2652_v42, %v2087_v1 }
 0x2c0   : > { %v3809_v47 = vpop.eup %3808  ;;  %v2657_v7 = vmul.f32 %v2653_v2, %v2088_v4 }
 0x2c1   : > { %v2754_v11 = vsub.f32 %v2659_v61, %v2664_v9  ;;  %v2660_v12 = vadd.f32 %v2656_v43, %v837_v3  ;;  %v2089_v13 = vmul.f32 %v3809_v47, %v835_v6 }
 0x2c2   : > { %v2661_v14 = vadd.f32 %v2657_v7, %v838_v5 }
 0x2c3   : > { %v2667_v17 = vand.u32 4294901760, %v2660_v12  ;;  %2102 = vperm.xlu1 %3801, %v2088_v4   ;;  %v2658_v18 = vmul.f32 %v2654_v10, %v2089_v13  ;;  %v2755_v19 = vand.u32 4294901760, %v2754_v11 }
 0x2c4   : > { %v2670_v21 = vand.u32 4294901760, %v2661_v14 }
 0x2c5   : > { %v3663_v22 = vpack.c.bf16 %v2667_v17, %v2664_v9  ;;  %v2761_v23 = vsub.f32 %v2660_v12, %v2667_v17  ;;  %v2662_v24 = vadd.f32 %v2658_v18, %v839_v15  ;;  %v2756_v20 = vsub.f32 %v2754_v11, %v2755_v19 }
 0x2c6   : > { %v2768_v52 = vsub.f32 %v2661_v14, %v2670_v21 }
 0x2c7   : > { %3664 = vmatprep.subr.bf16.mxu1 %v3663_v22  ;;  %v2673_v27 = vand.u32 4294901760, %v2662_v24  ;;  %2107 = vperm.xlu1 %3801, %v2089_v13   ;;  %v2762_v28 = vand.u32 4294901760, %v2761_v23  ;;  %v3679_v29 = vpack.c.bf16 %v2761_v23, %v2754_v11  ;;  %v2757_v34 = vand.u32 4294901760, %v2756_v20 }
 0x2c8   : > { %3666 = vmatpush3.bf16.msra.mxu1 %v3663_v22  ;;  %v2769_v26 = vand.u32 4294901760, %v2768_v52 }
 0x2c9   : > { %v2775_v30 = vsub.f32 %v2662_v24, %v2673_v27  ;;  %v3667_v31 = vpack.c.bf16 %v2673_v27, %v2670_v21  ;;  %v2763_v32 = vsub.f32 %v2761_v23, %v2762_v28  ;;  %v3695_v33 = vpack.c.bf16 %v2762_v28, %v2755_v19 }
 0x2ca   : > { %v2770_v46 = vsub.f32 %v2768_v52, %v2769_v26 }
 0x2cb   : > { %3668 = vmatprep.subr.bf16.mxu1 %v3667_v31  ;;  %v2764_v41 = vand.u32 4294901760, %v2763_v32  ;;  %v2776_v48 = vand.u32 4294901760, %v2775_v30  ;;  %v3683_v49 = vpack.c.bf16 %v2775_v30, %v2768_v52 }
 0x2cc   : > { %3670 = vmatpush3.bf16.msra.mxu1 %v3667_v31  ;;  %v2771_v54 = vand.u32 4294901760, %v2770_v46 }
 0x2cd   : > { %v3671_v50 = vpack.c.bf16 %v2764_v41, %v2757_v34  ;;  %v2777_v51 = vsub.f32 %v2775_v30, %v2776_v48  ;;  %v3699_v53 = vpack.c.bf16 %v2776_v48, %v2769_v26 }
 0x2cf   : > { %3672 = vmatprep.subr.bf16.mxu1 %v3671_v50  ;;  %3558 = vmatmul.mubr.f32.vlgmr.msra.gmra.mrb[4].mxu1 %v4109_v38  ;;  %v2778_v55 = vand.u32 4294901760, %v2777_v51 }
 0x2d0   : > { %3674 = vmatpush3.bf16.msra.mxu1 %v3671_v50  ;;  %3568 = vmatprep.mubr.f32.mxu1 %v4015_v35 }
 0x2d1   : > { %v3675_v56 = vpack.c.bf16 %v2778_v55, %v2771_v54 }
 0x2d3   : > { %3676 = vmatprep.subr.bf16.mxu1 %v3675_v56 }
 0x2d4   : > { %3678 = vmatpush3.bf16.msra.mxu1 %v3675_v56 }
 0x2d5   : > { %3680 = vmatprep.subr.bf16.mxu1 %v3679_v29 }
 0x2d7   : > { %3569 = vmatmul.mubr.f32.vlgmr.msra.gmra.mrb[4].mxu1 %v4079_v59 }
 0x2d8   : > { %3682 = vmatpush3.bf16.msra.mxu1 %v3679_v29  ;;  %3579 = vmatprep.mubr.f32.mxu1 %v4018_v36 }
 0x2d9   : > { %3684 = vmatprep.subr.bf16.mxu1 %v3683_v49 }
 0x2dc   : > { %3686 = vmatpush3.bf16.msra.mxu1 %v3683_v49 }
 0x2dd   : > { %3688 = vmatprep.subr.bf16.mxu1 %v3663_v22 }
 0x2df   : > { %3580 = vmatmul.mubr.f32.vlgmr.msra.gmra.mrb[4].mxu1 %v4095_v8 }
 0x2e0   : > { %3690 = vmatpush3.bf16.msra.mxu1 %v3663_v22  ;;  %3590 = vmatprep.mubr.f32.mxu1 %v4021_v37 }
 0x2e1   : > { %3692 = vmatprep.subr.bf16.mxu1 %v3667_v31 }
 0x2e4   : > { %3694 = vmatpush3.bf16.msra.mxu1 %v3667_v31 }
 0x2e5   : > { %3696 = vmatprep.subr.bf16.mxu1 %v3695_v33 }
 0x2e7   : > { %3591 = vmatmul.mubr.f32.vlgmr.msra.gmra.mrb[4].mxu1 %v4105_v16 }
 0x2e8   : > { %3698 = vmatpush3.bf16.msra.mxu1 %v3695_v33  ;;  %3601 = vmatprep.mubr.f32.mxu1 %v4015_v35 }
 0x2e9   : > { %3700 = vmatprep.subr.bf16.mxu1 %v3699_v53 }
 0x2ec   : > { %3702 = vmatpush3.bf16.msra.mxu1 %v3699_v53 }
 0x2ed   : > { %3704 = vmatprep.subr.bf16.mxu1 %v3663_v22 }
 0x2ef   : > { %3602 = vmatmul.mubr.f32.vlgmr.msra.gmra.mrb[4].mxu1 %v4079_v59 }
 0x2f0   : > { %3706 = vmatpush3.bf16.msra.mxu1 %v3663_v22  ;;  %3612 = vmatprep.mubr.f32.mxu1 %v4015_v35 }
 0x2f1   : > { %3708 = vmatprep.subr.bf16.mxu1 %v3667_v31 }
 0x2f4   : > { %3710 = vmatpush3.bf16.msra.mxu1 %v3667_v31 }
 0x2f7   : > { %3613 = vmatmul.mubr.f32.vlgmr.msra.gmra.mrb[4].mxu1 %v4079_v59 }
 0x33a   : > { %v2093_v57 = vpop.permute.xlu0 %2092 }
 0x33b   : > { %v2110_v58 = vmul.f32 %v2093_v57, %v3917_v39 }
 0x33d   : > { %v2122_v60 = vand.u32 4294901760, %v2110_v58 }
 0x33e   : > { %v2098_v62 = vpop.permute.xlu1 %2097 }
 0x33f   : > { %v2212_v63 = vsub.f32 %v2110_v58, %v2122_v60  ;;  %v2111_v0 = vmul.f32 %v2098_v62, %v3922_v40 }
 0x341   : > { %v2125_v42 = vand.u32 4294901760, %v2111_v0  ;;  %v2213_v1 = vand.u32 4294901760, %v2212_v63 }
 0x342   : > { %v2103_v61 = vpop.permute.xlu1 %2102 }
 0x343   : > { %v3615_v2 = vpack.c.bf16 %v2125_v42, %v2122_v60  ;;  %v2219_v3 = vsub.f32 %v2111_v0, %v2125_v42  ;;  %v2112_v4 = vmul.f32 %v2103_v61, %v3932_v44  ;;  %v2214_v47 = vsub.f32 %v2212_v63, %v2213_v1 }
 0x345   : > { %v2220_v6 = vand.u32 4294901760, %v2219_v3  ;;  %v2128_v9 = vand.u32 4294901760, %v2112_v4  ;;  %3616 = vmatprep.subr.bf16.mxu0 %v3615_v2  ;;  %v2215_v14 = vand.u32 4294901760, %v2214_v47  ;;  %v3631_v22 = vpack.c.bf16 %v2219_v3, %v2212_v63 }
 0x346   : > { %3618 = vmatpush3.bf16.msra.mxu0 %v3615_v2  ;;  %v2108_v43 = vpop.permute.xlu1 %2107 }
 0x347   : > { %v2226_v5 = vsub.f32 %v2112_v4, %v2128_v9  ;;  %v2113_v39 = vmul.f32 %v2108_v43, %v3937_v45  ;;  %v2221_v7 = vsub.f32 %v2219_v3, %v2220_v6  ;;  %v3647_v24 = vpack.c.bf16 %v2220_v6, %v2213_v1 }
 0x349   : > { %v2227_v10 = vand.u32 4294901760, %v2226_v5  ;;  %v2131_v11 = vand.u32 4294901760, %v2113_v39  ;;  %v2222_v40 = vand.u32 4294901760, %v2221_v7 }
 0x34b   : > { %v3619_v12 = vpack.c.bf16 %v2131_v11, %v2128_v9  ;;  %v2233_v13 = vsub.f32 %v2113_v39, %v2131_v11  ;;  %v3623_v17 = vpack.c.bf16 %v2222_v40, %v2215_v14  ;;  %v2228_v44 = vsub.f32 %v2226_v5, %v2227_v10 }
 0x34d   : > { %v2234_v15 = vand.u32 4294901760, %v2233_v13  ;;  %3620 = vmatprep.subr.bf16.mxu0 %v3619_v12  ;;  %v2229_v19 = vand.u32 4294901760, %v2228_v44  ;;  %v3635_v23 = vpack.c.bf16 %v2233_v13, %v2226_v5 }
 0x34e   : > { %3622 = vmatpush3.bf16.msra.mxu0 %v3619_v12 }
 0x34f   : > { %3624 = vmatprep.subr.bf16.mxu0 %v3623_v17  ;;  %v2235_v18 = vsub.f32 %v2233_v13, %v2234_v15  ;;  %v3651_v52 = vpack.c.bf16 %v2234_v15, %v2227_v10 }
 0x351   : > { %3492 = vmatmul.mubr.f32.vlgmr.msra.gmra.mrb[4].mxu0 %v4109_v38  ;;  %v2236_v21 = vand.u32 4294901760, %v2235_v18 }
 0x352   : > { %3626 = vmatpush3.bf16.msra.mxu0 %v3623_v17  ;;  %3502 = vmatprep.mubr.f32.mxu0 %v4015_v35 }
 0x353   : > { %v3627_v45 = vpack.c.bf16 %v2236_v21, %v2229_v19 }
 0x355   : > { %3628 = vmatprep.subr.bf16.mxu0 %v3627_v45 }
 0x356   : > { %3630 = vmatpush3.bf16.msra.mxu0 %v3627_v45 }
 0x357   : > { %3632 = vmatprep.subr.bf16.mxu0 %v3631_v22 }
 0x359   : > { %3503 = vmatmul.mubr.f32.vlgmr.msra.gmra.mrb[4].mxu0 %v4079_v59 }
 0x35a   : > { %3634 = vmatpush3.bf16.msra.mxu0 %v3631_v22  ;;  %3513 = vmatprep.mubr.f32.mxu0 %v4018_v36  ;;  %v843_v36 = vld [vmem:[%s4173_s6 + $0x8] sm:$0xf] }
 0x35b   : > { %3636 = vmatprep.subr.bf16.mxu0 %v3635_v23 }
 0x35e   : > { %3638 = vmatpush3.bf16.msra.mxu0 %v3635_v23 }
 0x35f   : > { %3640 = vmatprep.subr.bf16.mxu0 %v3615_v2 }
 0x361   : > { %3514 = vmatmul.mubr.f32.vlgmr.msra.gmra.mrb[4].mxu0 %v4095_v8 }
 0x362   : > { %3642 = vmatpush3.bf16.msra.mxu0 %v3615_v2  ;;  %3524 = vmatprep.mubr.f32.mxu0 %v4021_v37  ;;  %v842_v37 = vld [vmem:[%s4173_s6] sm:$0xff] }
 0x363   : > { %3644 = vmatprep.subr.bf16.mxu0 %v3619_v12 }
 0x366   : > { %3646 = vmatpush3.bf16.msra.mxu0 %v3619_v12 }
 0x367   : > { %3648 = vmatprep.subr.bf16.mxu0 %v3647_v24 }
 0x369   : > { %3525 = vmatmul.mubr.f32.vlgmr.msra.gmra.mrb[4].mxu0 %v4105_v16 }
 0x36a   : > { %3650 = vmatpush3.bf16.msra.mxu0 %v3647_v24  ;;  %3535 = vmatprep.mubr.f32.mxu0 %v4015_v35 }
 0x36b   : > { %3652 = vmatprep.subr.bf16.mxu0 %v3651_v52 }
 0x36e   : > { %3654 = vmatpush3.bf16.msra.mxu0 %v3651_v52 }
 0x36f   : > { %3656 = vmatprep.subr.bf16.mxu0 %v3615_v2 }
 0x371   : > { %3536 = vmatmul.mubr.f32.vlgmr.msra.gmra.mrb[4].mxu0 %v4079_v59 }
 0x372   : > { %3658 = vmatpush3.bf16.msra.mxu0 %v3615_v2  ;;  %3546 = vmatprep.mubr.f32.mxu0 %v4015_v35 }
 0x373   : > { %3660 = vmatprep.subr.bf16.mxu0 %v3619_v12 }
 0x376   : > { %3662 = vmatpush3.bf16.msra.mxu0 %v3619_v12 }
 0x379   : > { %3547 = vmatmul.mubr.f32.vlgmr.msra.gmra.mrb[4].mxu0 %v4079_v59 }
 0x3ca   : > { %v3614_v8 = vpop.f32.mrb[4].mxu1 }
 0x3cb   : > { %v3711_v16 = vadd.f32 %v3614_v8, %v843_v36  ;;  %v3181_v20 = vpop.f32.mrb[5].mxu1 }
 0x3cc   : > { %v3712_v25 = vadd.f32 %v3181_v20, %v842_v37 }
 0x3cd   : > { %3193 = vst.msk [vmem:[%s4175_s8 + $0x8] sm:$0xf] %vm342_vm3, %v3711_v16 }
 0x3ce   : > { %3192 = vst.msk [vmem:[%s4175_s8] sm:$0xff] %vm3191_vm7, %v3712_v25 }
 0x44c   : > { %v3548_v35 = vpop.f32.mrb[4].mxu0 }
 0x44d   : > { %2650 = vst.msk [vmem:[%s4174_s7 + $0x8] sm:$0xf] %vm818_vm4, %v3548_v35  ;;  %v2639_v59 = vpop.f32.mrb[5].mxu0 }
 0x44e   : > { %2649 = vst.msk [vmem:[%s4174_s7] sm:$0xff] %vm844_vm5, %v2639_v59 }
 0x44f PF: > { %s19_s29 = sadd.s32 1, %s3832_s29   ;;  %s4176_s27 = smov %s3828_s28 }
 0x450   : > { %p16_p7 = scmp.ge.s32.totalorder %s19_s29, 4   ;;  %s4177_s28 = smov %s4179_s30 }
 0x452   :  { %18 = sbr.rel (!%p16_p7) target bundleno = 2 (0x2), region = 90 }

</bundles_post_ra>
